<compile_context>
chip_gen: v6e
topology: v6e:2x2x1
jax: 0.10.0
libtpu: 0.0.40
codegen_flags: <defaults>
</compile_context>

<pallas_src>
import functools
import math

import jax
import jax.numpy as jnp
from jax import lax
from jax.experimental import pallas as pl
from jax.experimental.pallas import tpu as pltpu

NUM_EMOTION = 8
NUM_STYLE = 27
FEAT = 960            # MobileNetV3-Large feature dim (cnn.classifier = Identity)
HIDDEN = 512          # hidden width of each classifier head
OUT_PACKED = 128      # lane-dense packed output: [0:8]=emotion, [8:35]=style, rest pad
S_TILE_MAX = 8192     # spatial (lane) tile; safe for v7x 64 MiB VMEM at b_blk=128
B_BLK_MAX = 128       # max batches per block


def _round_up(x, m):
    return ((x + m - 1) // m) * m


def _cdiv(a, b):
    return -(-a // b)


# ----------------------------------------------------------------------------
# Pallas kernel: tiled global-avg-pool (lane-dense accumulator) + fused heads.
# ----------------------------------------------------------------------------
def emotion_kernel(x_ref, wf_ref, b1_ref, w2_ref, b2_ref, out_ref, acc_ref, *,
                   total_s, s_tile, num_channels, b_blk, mask_spatial):
    """x_ref   : [b_blk*C, s_tile] f32/bf16 (rows = batch-major (b, c); spatial on lanes)
       wf_ref  : [C, 2*HIDDEN]     f32 (wproj and 1/S folded into both heads' 1st layers)
       b1_ref  : [1, 2*HIDDEN]     f32
       w2_ref  : [2*HIDDEN, OUT_PACKED] bf16, block-diagonal (emotion | style)
       b2_ref  : [1, OUT_PACKED]   f32
       out_ref : [b_blk, OUT_PACKED] f32 (packed; wrapper slices the two heads)
       acc_ref : [b_blk*C, 128]    f32 lane-dense running spatial sum (scratch)
    """
    s_idx = pl.program_id(1)
    s_last = pl.num_programs(1) - 1
    n_slices = s_tile // 128          # s_tile is always a multiple of 128

    @pl.when(s_idx == 0)
    def _init():
        acc_ref[...] = jnp.zeros_like(acc_ref)

    def _load_slice(i, masked):
        # Lane-aligned (b_blk*C, 128) slice straight from the VMEM block (no big temp).
        v = x_ref[:, i * 128:(i + 1) * 128].astype(jnp.float32)
        if masked:
            col = (s_idx * s_tile + i * 128
                   + lax.broadcasted_iota(jnp.int32, v.shape, 1))
            v = jnp.where(col < total_s, v, 0.0)
        return v

    def _accumulate(masked):
        # Fold s_tile lanes down to 128 with pure VPU adds; cross-lane reduce deferred
        # to the finalize step -> no XLU / narrow masked stores in the steady state.
        part = _load_slice(0, masked)
        for i in range(1, n_slices):
            part = part + _load_slice(i, masked)
        acc_ref[...] += part

    if mask_spatial:
        @pl.when(s_idx < s_last)
        def _steady():
            _accumulate(False)

        @pl.when(s_idx == s_last)
        def _ragged():
            _accumulate(True)           # zero out the garbage lanes past S
    else:
        _accumulate(False)

    @pl.when(s_idx == s_last)
    def _finalize():
        # 1/S is folded into wf, so the raw spatial sums feed the folded first layers.
        # K == C is degenerate for the MXU, so the first layers are VPU broadcast-MACs.
        h = jnp.broadcast_to(b1_ref[...], (b_blk, b1_ref.shape[1]))
        for c in range(num_channels):   # static unroll (C == 3)
            # De-interleave channel c: strided sublane slice of the accumulator.
            ch = acc_ref[pl.ds(c, b_blk, stride=num_channels), :]      # [b_blk, 128]
            s_c = jnp.sum(ch, axis=-1, keepdims=True)                  # [b_blk, 1]
            h = h + s_c * wf_ref[c:c + 1, :]
        h = jnp.maximum(h, 0.0)                                        # ReLU (f32, VPU)

        # Second layers of both heads as ONE block-diagonal bf16 MXU matmul with f32
        # accumulation; single lane-dense store of the packed output.
        out = jnp.dot(h.astype(jnp.bfloat16), w2_ref[...],
                      preferred_element_type=jnp.float32) + b2_ref[...]
        out_ref[...] = out.astype(out_ref.dtype)


# ----------------------------------------------------------------------------
# Deterministic parameter initialization (mirrors _initialize_weights):
#   kaiming_normal_(W, mode='fan_out', nonlinearity='relu') -> std = sqrt(2/out)
#   bias = 0.  Weights stored transposed (in, out) so forward is x @ W.
# ----------------------------------------------------------------------------
def init_params(key):
    ks = jax.random.split(key, 5)

    def kaiming_fan_out(k, out_f, in_f):
        std = math.sqrt(2.0 / out_f)
        w = std * jax.random.normal(k, (out_f, in_f), dtype=jnp.float32)  # torch (out,in)
        return jnp.transpose(w)                                           # stored (in,out)

    return {
        # backbone stand-in projection (synthetic, deterministic)
        "wproj": 0.05 * jax.random.normal(ks[0], (3, FEAT), dtype=jnp.float32),
        # emotion head
        "w1e": kaiming_fan_out(ks[1], HIDDEN, FEAT),
        "b1e": jnp.zeros((1, HIDDEN), jnp.float32),
        "w2e": kaiming_fan_out(ks[2], NUM_EMOTION, HIDDEN),
        "b2e": jnp.zeros((1, NUM_EMOTION), jnp.float32),
        # style head
        "w1s": kaiming_fan_out(ks[3], HIDDEN, FEAT),
        "b1s": jnp.zeros((1, HIDDEN), jnp.float32),
        "w2s": kaiming_fan_out(ks[4], NUM_STYLE, HIDDEN),
        "b2s": jnp.zeros((1, NUM_STYLE), jnp.float32),
    }


def pack_params(params):
    """Fold wproj into the first-layer weights and fuse/pack both heads."""
    wf = jnp.concatenate([params["wproj"] @ params["w1e"],
                          params["wproj"] @ params["w1s"]], axis=1)        # [3, 1024] f32
    b1 = jnp.concatenate([params["b1e"], params["b1s"]], axis=1)           # [1, 1024] f32
    w2 = jnp.zeros((2 * HIDDEN, OUT_PACKED), jnp.float32)                  # block-diagonal
    w2 = w2.at[:HIDDEN, :NUM_EMOTION].set(params["w2e"])
    w2 = w2.at[HIDDEN:, NUM_EMOTION:NUM_EMOTION + NUM_STYLE].set(params["w2s"])
    b2 = jnp.zeros((1, OUT_PACKED), jnp.float32)
    b2 = b2.at[:, :NUM_EMOTION].set(params["b2e"])
    b2 = b2.at[:, NUM_EMOTION:NUM_EMOTION + NUM_STYLE].set(params["b2s"])
    return wf, b1, w2.astype(jnp.bfloat16), b2


# ----------------------------------------------------------------------------
# Wrapper: free reshape only (no pad/copy of the images); one Pallas call.
# ----------------------------------------------------------------------------
@jax.jit
def emotion_model_forward(images, params):
    B, C, H, W = images.shape
    S = H * W

    # NCHW -> [B*C, S] is a free row-major reshape: big S axis on lanes, no 3-of-8
    # sublane padding, no jnp.pad copy.  Keep f32/bf16 native; upcast anything else.
    x = images.reshape(B * C, S)
    if x.dtype != jnp.float32 and x.dtype != jnp.bfloat16:
        x = x.astype(jnp.float32)   # TODO(synk): native uint8 accumulation path

    # Spatial tile: always a multiple of 128; the ragged tail (S % s_tile) is masked
    # in-kernel.  8192 keeps the double-buffered input ~25 MB at b_blk=128 (v7x-safe);
    # v5e/v6e (128 MiB VMEM) could use a larger tile.
    s_tile = S_TILE_MAX if S > S_TILE_MAX else _round_up(S, 128)
    assert s_tile % 128 == 0
    ns = _cdiv(S, s_tile)
    mask_spatial = (S % s_tile) != 0

    # Batch blocking: >= 2 "parallel" blocks when B >= 16 (keeps both v7x cores busy);
    # b_blk is a multiple of 8 so every block is sublane-aligned.  Rows past B*C in a
    # partial block are garbage and are sliced off below.
    if B >= 16:
        b_blk = min(B_BLK_MAX, _round_up(_cdiv(B, 2), 8))
    else:
        b_blk = _round_up(B, 8)
    nb = _cdiv(B, b_blk)
    out_rows = nb * b_blk

    wf, b1, w2, b2 = pack_params(params)
    wf = wf * (1.0 / float(S))      # fold the global-average-pool 1/S into the 1st layer

    kernel = functools.partial(
        emotion_kernel, total_s=S, s_tile=s_tile, num_channels=C,
        b_blk=b_blk, mask_spatial=mask_spatial)

    # Memory-bound reduce + tiny head matmuls: give XLA an honest cost estimate.
    flops = 2 * out_rows * 2 * HIDDEN * (C + OUT_PACKED) + B * C * S
    bytes_accessed = (B * C * S * x.dtype.itemsize + wf.size * 4 + b1.size * 4
                      + w2.size * 2 + b2.size * 4 + out_rows * OUT_PACKED * 4)

    out = pl.pallas_call(
        kernel,
        out_shape=jax.ShapeDtypeStruct((out_rows, OUT_PACKED), jnp.float32),
        grid_spec=pltpu.PrefetchScalarGridSpec(
            num_scalar_prefetch=0,
            grid=(nb, ns),                                # spatial reduction axis last
            in_specs=[
                pl.BlockSpec((b_blk * C, s_tile), lambda b, s: (b, s)),     # image tiles
                pl.BlockSpec((C, 2 * HIDDEN), lambda b, s: (0, 0)),         # folded W1
                pl.BlockSpec((1, 2 * HIDDEN), lambda b, s: (0, 0)),         # b1 packed
                pl.BlockSpec((2 * HIDDEN, OUT_PACKED), lambda b, s: (0, 0)),  # W2 blkdiag
                pl.BlockSpec((1, OUT_PACKED), lambda b, s: (0, 0)),         # b2 packed
            ],
            out_specs=pl.BlockSpec((b_blk, OUT_PACKED), lambda b, s: (b, 0)),
            scratch_shapes=[pltpu.VMEM((b_blk * C, 128), jnp.float32)],     # lane-dense acc
        ),
        compiler_params=pltpu.CompilerParams(
            dimension_semantics=("parallel", "arbitrary"),
            vmem_limit_bytes=48 * 1024 * 1024,            # fits v7x's 64 MiB physical VMEM
        ),
        cost_estimate=pl.CostEstimate(flops=flops, transcendentals=0,
                                      bytes_accessed=bytes_accessed),
    )(x, wf, b1, w2, b2)

    emotion = out[:B, :NUM_EMOTION]
    style = out[:B, NUM_EMOTION:NUM_EMOTION + NUM_STYLE]
    return emotion, style


# Pure-JAX f32 reference (un-folded, un-fused) for correctness checking.
def reference_forward(images, params):
    B, C, H, W = images.shape
    pooled = jnp.mean(images.astype(jnp.float32).reshape(B, C, H * W), axis=-1)  # [B, C]
    feat = pooled @ params["wproj"]                                              # [B, 960]
    h = jnp.maximum(feat @ params["w1e"] + params["b1e"], 0.0)
    emo = h @ params["w2e"] + params["b2e"]
    g = jnp.maximum(feat @ params["w1s"] + params["b1s"], 0.0)
    sty = g @ params["w2s"] + params["b2s"]
    return emo, sty


def _check(images, params, tag):
    emo, sty = emotion_model_forward(images, params)
    emo, sty = jax.block_until_ready((emo, sty))
    B = images.shape[0]
    assert emo.shape == (B, NUM_EMOTION), (tag, emo.shape)
    assert sty.shape == (B, NUM_STYLE), (tag, sty.shape)
    emo_ref, sty_ref = reference_forward(images, params)
    # Slightly loosened vs pure f32: wproj/1-over-S folding + bf16 second-layer matmul.
    assert jnp.allclose(emo, emo_ref, atol=1e-2, rtol=2e-2), (
        tag, float(jnp.max(jnp.abs(emo - emo_ref))))
    assert jnp.allclose(sty, sty_ref, atol=1e-2, rtol=2e-2), (
        tag, float(jnp.max(jnp.abs(sty - sty_ref))))


if __name__ == "__main__":
    key = jax.random.PRNGKey(0)
    kx1, kx2, kx3, kp = jax.random.split(key, 4)
    params = init_params(kp)

    # Primary small test: batch=2 RGB 16x16 (exact spatial tile, single batch block).
    images = jax.random.normal(kx1, (2, 3, 16, 16), dtype=jnp.float32)
    _check(images, params, "16x16")

    # Ragged spatial tail: 96x96 -> S=9216 > 8192 tile (multi-tile + in-kernel mask).
    images2 = jax.random.normal(kx2, (2, 3, 96, 96), dtype=jnp.float32)
    _check(images2, params, "96x96")

    # Partial batch block: B=18 with b_blk=16 (garbage rows sliced off by the wrapper).
    images3 = jax.random.normal(kx3, (18, 3, 16, 16), dtype=jnp.float32)
    _check(images3, params, "B18")

    print("KERNEL_OK")
</pallas_src>

<mosaic_0001>
module attributes {stable_mosaic.version = 11 : i64} {
  func.func @emotion_kernel(%arg0: i32, %arg1: i32, %arg2: memref<24x256xf32, #tpu.memory_space<vmem>>, %arg3: memref<3x1024xf32, #tpu.memory_space<vmem>>, %arg4: memref<1x1024xf32, #tpu.memory_space<vmem>>, %arg5: memref<1024x128xbf16, #tpu.memory_space<vmem>>, %arg6: memref<1x128xf32, #tpu.memory_space<vmem>>, %arg7: memref<8x128xf32, #tpu.memory_space<vmem>>, %arg8: memref<24x128xf32, #tpu.memory_space<vmem>>) attributes {dimension_semantics = [#tpu.dimension_semantics<parallel>, #tpu.dimension_semantics<arbitrary>], iteration_bounds = array<i64: 1, 1>, scalar_prefetch = 0 : i64, scratch_operands = 1 : i64, tpu.core_type = #tpu.core_type<tc>, window_params = [{transform_indices = @transform_0, window_bounds = array<i64: 24, 256>}, {pipeline_mode = #tpu.pipeline_mode<synchronous>, transform_indices = @transform_1, window_bounds = array<i64: 3, 1024>}, {pipeline_mode = #tpu.pipeline_mode<synchronous>, transform_indices = @transform_2, window_bounds = array<i64: 1, 1024>}, {pipeline_mode = #tpu.pipeline_mode<synchronous>, transform_indices = @transform_3, window_bounds = array<i64: 1024, 128>}, {pipeline_mode = #tpu.pipeline_mode<synchronous>, transform_indices = @transform_4, window_bounds = array<i64: 1, 128>}, {transform_indices = @transform_5, window_bounds = array<i64: 8, 128>}]} {
    %c0_i32 = arith.constant 0 : i32
    %0 = arith.cmpi eq, %arg1, %c0_i32 : i32
    %1 = arith.extui %0 : i1 to i32
    %c0_i32_0 = arith.constant 0 : i32
    %2 = arith.cmpi ne, %1, %c0_i32_0 : i32
    scf.if %2 {
      %cst = arith.constant 0.000000e+00 : f32
      %12 = vector.broadcast %cst : f32 to vector<24x128xf32>
      %c0_9 = arith.constant 0 : index
      %c0_10 = arith.constant 0 : index
      %13 = vector.load %arg8[%c0_9, %c0_10] : memref<24x128xf32, #tpu.memory_space<vmem>>, vector<24x128xf32>
      tpu.vector_store %arg8[%c0_9, %c0_10], %12 {strides = array<i32>} : memref<24x128xf32, #tpu.memory_space<vmem>>, vector<24x128xf32>,
    } else {
    }
    %c0 = arith.constant 0 : index
    %c0_1 = arith.constant 0 : index
    %3 = vector.load %arg2[%c0, %c0_1] : memref<24x256xf32, #tpu.memory_space<vmem>>, vector<24x128xf32>
    %c0_2 = arith.constant 0 : index
    %c128 = arith.constant 128 : index
    %4 = vector.load %arg2[%c0_2, %c128] : memref<24x256xf32, #tpu.memory_space<vmem>>, vector<24x128xf32>
    %5 = arith.addf %3, %4 : vector<24x128xf32>
    %c0_3 = arith.constant 0 : index
    %c0_4 = arith.constant 0 : index
    %6 = vector.load %arg8[%c0_3, %c0_4] : memref<24x128xf32, #tpu.memory_space<vmem>>, vector<24x128xf32>
    %7 = arith.addf %6, %5 : vector<24x128xf32>
    %c0_5 = arith.constant 0 : index
    %c0_6 = arith.constant 0 : index
    %8 = vector.load %arg8[%c0_5, %c0_6] : memref<24x128xf32, #tpu.memory_space<vmem>>, vector<24x128xf32>
    tpu.vector_store %arg8[%c0_5, %c0_6], %7 {strides = array<i32>} : memref<24x128xf32, #tpu.memory_space<vmem>>, vector<24x128xf32>,
    %c0_i32_7 = arith.constant 0 : i32
    %9 = arith.cmpi eq, %arg1, %c0_i32_7 : i32
    %10 = arith.extui %9 : i1 to i32
    %c0_i32_8 = arith.constant 0 : i32
    %11 = arith.cmpi ne, %10, %c0_i32_8 : i32
    scf.if %11 {
      %c0_9 = arith.constant 0 : index
      %c0_10 = arith.constant 0 : index
      %12 = vector.load %arg4[%c0_9, %c0_10] : memref<1x1024xf32, #tpu.memory_space<vmem>>, vector<1x1024xf32>
      %13 = vector.shape_cast %12 : vector<1x1024xf32> to vector<1x1024xf32>
      %14 = vector.broadcast %13 : vector<1x1024xf32> to vector<8x1024xf32>
      %c0_11 = arith.constant 0 : index
      %c0_12 = arith.constant 0 : index
      %15 = tpu.strided_load %arg8[%c0_11, %c0_12] {strides = array<i32: 3, 1>} : memref<24x128xf32, #tpu.memory_space<vmem>>, vector<8x128xf32>
      %cst = arith.constant dense<0.000000e+00> : vector<8xf32>
      %16 = vector.multi_reduction <add>, %15, %cst [1] : vector<8x128xf32> to vector<8xf32>
      %17 = vector.shape_cast %16 : vector<8xf32> to vector<8x1xf32>
      %c0_13 = arith.constant 0 : index
      %c0_14 = arith.constant 0 : index
      %18 = vector.load %arg3[%c0_13, %c0_14] : memref<3x1024xf32, #tpu.memory_space<vmem>>, vector<1x1024xf32>
      %19 = vector.broadcast %17 : vector<8x1xf32> to vector<8x1024xf32>
      %20 = vector.broadcast %18 : vector<1x1024xf32> to vector<8x1024xf32>
      %21 = arith.mulf %19, %20 : vector<8x1024xf32>
      %22 = arith.addf %14, %21 : vector<8x1024xf32>
      %c1 = arith.constant 1 : index
      %c0_15 = arith.constant 0 : index
      %23 = tpu.strided_load %arg8[%c1, %c0_15] {strides = array<i32: 3, 1>} : memref<24x128xf32, #tpu.memory_space<vmem>>, vector<8x128xf32>
      %cst_16 = arith.constant dense<0.000000e+00> : vector<8xf32>
      %24 = vector.multi_reduction <add>, %23, %cst_16 [1] : vector<8x128xf32> to vector<8xf32>
      %25 = vector.shape_cast %24 : vector<8xf32> to vector<8x1xf32>
      %c1_17 = arith.constant 1 : index
      %c0_18 = arith.constant 0 : index
      %26 = vector.load %arg3[%c1_17, %c0_18] : memref<3x1024xf32, #tpu.memory_space<vmem>>, vector<1x1024xf32>
      %27 = vector.broadcast %25 : vector<8x1xf32> to vector<8x1024xf32>
      %28 = vector.broadcast %26 : vector<1x1024xf32> to vector<8x1024xf32>
      %29 = arith.mulf %27, %28 : vector<8x1024xf32>
      %30 = arith.addf %22, %29 : vector<8x1024xf32>
      %c2 = arith.constant 2 : index
      %c0_19 = arith.constant 0 : index
      %31 = tpu.strided_load %arg8[%c2, %c0_19] {strides = array<i32: 3, 1>} : memref<24x128xf32, #tpu.memory_space<vmem>>, vector<8x128xf32>
      %cst_20 = arith.constant dense<0.000000e+00> : vector<8xf32>
      %32 = vector.multi_reduction <add>, %31, %cst_20 [1] : vector<8x128xf32> to vector<8xf32>
      %33 = vector.shape_cast %32 : vector<8xf32> to vector<8x1xf32>
      %c2_21 = arith.constant 2 : index
      %c0_22 = arith.constant 0 : index
      %34 = vector.load %arg3[%c2_21, %c0_22] : memref<3x1024xf32, #tpu.memory_space<vmem>>, vector<1x1024xf32>
      %35 = vector.broadcast %33 : vector<8x1xf32> to vector<8x1024xf32>
      %36 = vector.broadcast %34 : vector<1x1024xf32> to vector<8x1024xf32>
      %37 = arith.mulf %35, %36 : vector<8x1024xf32>
      %38 = arith.addf %30, %37 : vector<8x1024xf32>
      %cst_23 = arith.constant 0.000000e+00 : f32
      %39 = vector.broadcast %cst_23 : f32 to vector<8x1024xf32>
      %40 = arith.maximumf %38, %39 : vector<8x1024xf32>
      %41 = arith.truncf %40 : vector<8x1024xf32> to vector<8x1024xbf16>
      %c0_24 = arith.constant 0 : index
      %c0_25 = arith.constant 0 : index
      %42 = vector.load %arg5[%c0_24, %c0_25] : memref<1024x128xbf16, #tpu.memory_space<vmem>>, vector<1024x128xbf16>
      %cst_26 = arith.constant dense<0.000000e+00> : vector<8x128xf32>
      %43 = tpu.matmul %41, %42, %cst_26 {dimension_numbers = #tpu.dot_dimension_numbers<[1], [0], [0], [1], [0, 0, 1, 1], [], []>} : vector<8x1024xbf16>, vector<1024x128xbf16>, vector<8x128xf32> -> vector<8x128xf32>
      %c0_27 = arith.constant 0 : index
      %c0_28 = arith.constant 0 : index
      %44 = vector.load %arg6[%c0_27, %c0_28] : memref<1x128xf32, #tpu.memory_space<vmem>>, vector<1x128xf32>
      %45 = vector.broadcast %44 : vector<1x128xf32> to vector<8x128xf32>
      %46 = arith.addf %43, %45 : vector<8x128xf32>
      %c0_29 = arith.constant 0 : index
      %c0_30 = arith.constant 0 : index
      %47 = vector.load %arg7[%c0_29, %c0_30] : memref<8x128xf32, #tpu.memory_space<vmem>>, vector<8x128xf32>
      tpu.vector_store %arg7[%c0_29, %c0_30], %46 {strides = array<i32>} : memref<8x128xf32, #tpu.memory_space<vmem>>, vector<8x128xf32>,
    } else {
    }
    return
  }
  func.func @transform_0(%arg0: i32, %arg1: i32) -> (i32, i32) {
    %c0_i32 = arith.constant 0 : i32
    return %arg0, %arg1 : i32, i32
  }
  func.func @transform_1(%arg0: i32, %arg1: i32) -> (i32, i32) {
    %c0_i32 = arith.constant 0 : i32
    %c0_i32_0 = arith.constant 0 : i32
    %c0_i32_1 = arith.constant 0 : i32
    return %c0_i32, %c0_i32_0 : i32, i32
  }
  func.func @transform_2(%arg0: i32, %arg1: i32) -> (i32, i32) {
    %c0_i32 = arith.constant 0 : i32
    %c0_i32_0 = arith.constant 0 : i32
    %c0_i32_1 = arith.constant 0 : i32
    return %c0_i32, %c0_i32_0 : i32, i32
  }
  func.func @transform_3(%arg0: i32, %arg1: i32) -> (i32, i32) {
    %c0_i32 = arith.constant 0 : i32
    %c0_i32_0 = arith.constant 0 : i32
    %c0_i32_1 = arith.constant 0 : i32
    return %c0_i32, %c0_i32_0 : i32, i32
  }
  func.func @transform_4(%arg0: i32, %arg1: i32) -> (i32, i32) {
    %c0_i32 = arith.constant 0 : i32
    %c0_i32_0 = arith.constant 0 : i32
    %c0_i32_1 = arith.constant 0 : i32
    return %c0_i32, %c0_i32_0 : i32, i32
  }
  func.func @transform_5(%arg0: i32, %arg1: i32) -> (i32, i32) {
    %c0_i32 = arith.constant 0 : i32
    %c0_i32_0 = arith.constant 0 : i32
    return %arg0, %c0_i32 : i32, i32
  }
}

</mosaic_0001>

<bundles_post_ra>
// kernel: emotion_model_forward.1
= control target key start
LH: loop header
LB: loop body
LE: loop exit
PB: predicated region body
PF: predicated region fallthrough
CT: control target
= control target key end

     0   :  { %v51_v46 = vlaneseq  ;;  %s1536_s0 = inlined_call_operand.vmem [shape: f32[6,256], index: 0, kind: input, shape index: {}]   ;;  %s1537_s3 = inlined_call_operand.vmem [shape: bf16[1024,128], index: 3, kind: input, shape index: {}]   ;;  %s1538_s1 = inlined_call_operand.vmem [shape: f32[3,1024], index: 1, kind: input, shape index: {}]   ;;  %s1539_s2 = inlined_call_operand.vmem [shape: f32[1,1024], index: 2, kind: input, shape index: {}]   ;;  %s1540_s4 = inlined_call_operand.vmem [shape: f32[1,128], index: 4, kind: input, shape index: {}]   ;;  %s1541_s5 = inlined_call_operand.vmem [shape: f32[8,128], index: 5, kind: output, shape index: {}]  }
   0x1   :  { %v28_v0 = vld [vmem:[%s1536_s0] sm:$0xff]  ;;  %v29_v1 = vld [vmem:[%s1536_s0 + $0x10] sm:$0xff]  ;;  %v31_v3 = vld [vmem:[%s1536_s0 + $0x8] sm:$0xff] }
   0x2   :  { %v30_v2 = vld [vmem:[%s1536_s0 + $0x20] sm:$0xff]  ;;  %v32_v4 = vld [vmem:[%s1536_s0 + $0x18] sm:$0xff]  ;;  %v33_v5 = vld [vmem:[%s1536_s0 + $0x28] sm:$0xff]  ;;  %v34_v6 = vadd.f32 %v31_v3, %v28_v0  ;;  %v1348_v47 = vshrl.u32 %v51_v46, 7 }
   0x3   :  { %v35_v7 = vadd.f32 %v32_v4, %v29_v1  ;;  %v36_v8 = vadd.f32 %v33_v5, %v30_v2  ;;  %v1134_v9 = vld [vmem:[%s1537_s3 + $0x78] sm:$0xff]   ;;  %v1138_v13 = vld [vmem:[%s1537_s3 + $0x70] sm:$0xff]   ;;  %v1142_v17 = vld [vmem:[%s1537_s3 + $0x68] sm:$0xff]  }
   0x4   :  { %v1135_v10 = vld [vmem:[%s1537_s3 + $0xf8] sm:$0xff]   ;;  %1045 = vmatprep.subr.bf16.mxu0 %v1134_v9  ;;  %43 = vst [vmem:[#allocation2] sm:$0xff] %v34_v6  ;;  %v1139_v14 = vld [vmem:[%s1537_s3 + $0xf0] sm:$0xff]   ;;  %v1143_v18 = vld [vmem:[%s1537_s3 + $0xe8] sm:$0xff]   ;;  %v57_v48 = vsub.s32 1, %v1348_v47  ;;  %v65_v52 = vsub.s32 3, %v1348_v47 }
   0x5   :  { %v1136_v11 = vld [vmem:[%s1537_s3 + $0x38] sm:$0xff]   ;;  %1067 = vmatprep.subr.bf16.mxu1 %v1135_v10  ;;  %44 = vst [vmem:[#allocation2 + $0x8] sm:$0xff] %v35_v7  ;;  %45 = vst [vmem:[#allocation2 + $0x10] sm:$0xff] %v36_v8  ;;  %v1140_v15 = vld [vmem:[%s1537_s3 + $0x30] sm:$0xff]   ;;  %v53_v54 = vsub.s32 0, %v1348_v47  ;;  %v61_v55 = vsub.s32 2, %v1348_v47 }
   0x6   :  { %v1137_v12 = vld [vmem:[%s1537_s3 + $0xb8] sm:$0xff]   ;;  %1046 = vmatpush3.bf16.msra.mxu0 %v1136_v11  ;;  %v1141_v16 = vld [vmem:[%s1537_s3 + $0xb0] sm:$0xff]   ;;  %v1144_v19 = vld [vmem:[%s1537_s3 + $0x28] sm:$0xff]   ;;  %v73_v56 = vsub.s32 5, %v1348_v47  ;;  %v81_v57 = vsub.s32 7, %v1348_v47 }
   0x7   :  { %1068 = vmatpush3.bf16.msra.mxu1 %v1137_v12  ;;  %1047 = vmatprep.subr.bf16.mxu0 %v1138_v13  ;;  %v1145_v23 = vld [vmem:[%s1537_s3 + $0xa8] sm:$0xff]   ;;  %v1146_v24 = vld [vmem:[%s1537_s3 + $0x60] sm:$0xff]   ;;  %v1150_v28 = vld [vmem:[%s1537_s3 + $0x58] sm:$0xff]  }
   0x8   :  { %1069 = vmatprep.subr.bf16.mxu1 %v1139_v14  ;;  %v1147_v25 = vld [vmem:[%s1537_s3 + $0xe0] sm:$0xff]   ;;  %v1151_v29 = vld [vmem:[%s1537_s3 + $0xd8] sm:$0xff]   ;;  %v1154_v32 = vld [vmem:[%s1537_s3 + $0x50] sm:$0xff]  }
   0x9   :  { %v1148_v26 = vld [vmem:[%s1537_s3 + $0x20] sm:$0xff]   ;;  %v1152_v30 = vld [vmem:[%s1537_s3 + $0x18] sm:$0xff]   ;;  %v1155_v33 = vld [vmem:[%s1537_s3 + $0xd0] sm:$0xff]  }
   0xa   :  { %1048 = vmatpush3.bf16.msra.mxu0 %v1140_v15  ;;  %v1149_v27 = vld [vmem:[%s1537_s3 + $0xa0] sm:$0xff]   ;;  %v1153_v31 = vld [vmem:[%s1537_s3 + $0x98] sm:$0xff]   ;;  %v1156_v34 = vld [vmem:[%s1537_s3 + $0x10] sm:$0xff]  }
   0xb   :  { %1070 = vmatpush3.bf16.msra.mxu1 %v1141_v16  ;;  %1049 = vmatprep.subr.bf16.mxu0 %v1142_v17  ;;  %v1157_v35 = vld [vmem:[%s1537_s3 + $0x90] sm:$0xff]   ;;  %v1158_v36 = vld [vmem:[%s1537_s3 + $0x48] sm:$0xff]   ;;  %v1162_v40 = vld [vmem:[%s1537_s3 + $0x40] sm:$0xff]  }
   0xc   :  { %v91_v20 = vld [vmem:[#allocation2] ss:$3 sm:$0xff]  ;;  %v153_v21 = vld [vmem:[#allocation2 + $0x1] ss:$3 sm:$0xff]  ;;  %v216_v22 = vld [vmem:[#allocation2 + $0x2] ss:$3 sm:$0xff]  ;;  %1071 = vmatprep.subr.bf16.mxu1 %v1143_v18 }
   0xd   :  { %92 = vadd.xlane.f32.xlu0 %v91_v20  ;;  %217 = vadd.xlane.f32.xlu1 %v216_v22  ;;  %v1159_v37 = vld [vmem:[%s1537_s3 + $0xc8] sm:$0xff]   ;;  %v1163_v41 = vld [vmem:[%s1537_s3 + $0xc0] sm:$0xff]   ;;  %v1166_v44 = vld [vmem:[%s1537_s3 + $0x178] sm:$0xff]  }
   0xe   :  { %1050 = vmatpush3.bf16.msra.mxu0 %v1144_v19  ;;  %v1160_v38 = vld [vmem:[%s1537_s3 + $0x8] sm:$0xff]   ;;  %v1164_v42 = vld [vmem:[%s1537_s3] sm:$0xff]   ;;  %v1167_v45 = vld [vmem:[%s1537_s3 + $0x1f8] sm:$0xff]  }
   0xf   :  { %1072 = vmatpush3.bf16.msra.mxu1 %v1145_v23  ;;  %1051 = vmatprep.subr.bf16.mxu0 %v1146_v24  ;;  %v1161_v39 = vld [vmem:[%s1537_s3 + $0x88] sm:$0xff]   ;;  %v1165_v43 = vld [vmem:[%s1537_s3 + $0x80] sm:$0xff]  }
  0x10   :  { %1073 = vmatprep.subr.bf16.mxu1 %v1147_v25  ;;  %v1354_v49 = vld [vmem:[%s1539_s2] sm:$0xff] }
  0x11   :  { %154 = vadd.xlane.f32.xlu0 %v153_v21  ;;  %v1359_v50 = vld [vmem:[%s1538_s1] ss:$4 sm:$0xff]  ;;  %v1364_v51 = vld [vmem:[%s1538_s1 + $0x1] ss:$4 sm:$0xff]  ;;  %v1370_v53 = vld [vmem:[%s1538_s1 + $0x2] ss:$4 sm:$0xff]  ;;  %v58_v58 = vrot.slane %v1354_v49, %v57_v48  ;;  %v66_v61 = vrot.slane %v1354_v49, %v65_v52  ;;  %v54_v2 = vrot.slane %v1354_v49, %v53_v54  ;;  %v62_v6 = vrot.slane %v1354_v49, %v61_v55 }
  0x12   :  { %1052 = vmatpush3.bf16.msra.mxu0 %v1148_v26  ;;  %v103_v59 = vrot.slane %v1359_v50, %v57_v48  ;;  %v166_v60 = vrot.slane %v1364_v51, %v57_v48  ;;  %v229_v62 = vrot.slane %v1370_v53, %v57_v48  ;;  %v111_v63 = vrot.slane %v1359_v50, %v65_v52 }
  0x13   :  { %1074 = vmatpush3.bf16.msra.mxu1 %v1149_v27  ;;  %1053 = vmatprep.subr.bf16.mxu0 %v1150_v28  ;;  %v174_v0 = vrot.slane %v1364_v51, %v65_v52  ;;  %v237_v1 = vrot.slane %v1370_v53, %v65_v52  ;;  %v99_v3 = vrot.slane %v1359_v50, %v53_v54 }
  0x14   :  { %1075 = vmatprep.subr.bf16.mxu1 %v1151_v29  ;;  %v162_v4 = vrot.slane %v1364_v51, %v53_v54  ;;  %v225_v5 = vrot.slane %v1370_v53, %v53_v54  ;;  %v107_v7 = vrot.slane %v1359_v50, %v61_v55  ;;  %v170_v8 = vrot.slane %v1364_v51, %v61_v55 }
  0x15   :  { %v233_v9 = vrot.slane %v1370_v53, %v61_v55  ;;  %v74_v10 = vrot.slane %v1354_v49, %v73_v56  ;;  %v119_v11 = vrot.slane %v1359_v50, %v73_v56  ;;  %v182_v12 = vrot.slane %v1364_v51, %v73_v56 }
  0x16   :  { %1054 = vmatpush3.bf16.msra.mxu0 %v1152_v30  ;;  %v245_v13 = vrot.slane %v1370_v53, %v73_v56  ;;  %v82_v16 = vrot.slane %v1354_v49, %v81_v57  ;;  %v127_v17 = vrot.slane %v1359_v50, %v81_v57  ;;  %v190_v18 = vrot.slane %v1364_v51, %v81_v57 }
  0x17   :  { %1076 = vmatpush3.bf16.msra.mxu1 %v1153_v31  ;;  %1055 = vmatprep.subr.bf16.mxu0 %v1154_v32  ;;  %v253_v19 = vrot.slane %v1370_v53, %v81_v57 }
  0x18   :  { %1077 = vmatprep.subr.bf16.mxu1 %v1155_v33 }
  0x1a   :  { %1056 = vmatpush3.bf16.msra.mxu0 %v1156_v34 }
  0x1b   :  { %1078 = vmatpush3.bf16.msra.mxu1 %v1157_v35  ;;  %1057 = vmatprep.subr.bf16.mxu0 %v1158_v36 }
  0x1c   :  { %1079 = vmatprep.subr.bf16.mxu1 %v1159_v37 }
  0x1e   :  { %1058 = vmatpush3.bf16.msra.mxu0 %v1160_v38 }
  0x1f   :  { %1080 = vmatpush3.bf16.msra.mxu1 %v1161_v39  ;;  %1059 = vmatprep.subr.bf16.mxu0 %v1162_v40 }
  0x20   :  { %1081 = vmatprep.subr.bf16.mxu1 %v1163_v41 }
  0x22   :  { %1060 = vmatpush3.bf16.msra.mxu0 %v1164_v42 }
  0x23   :  { %1082 = vmatpush3.bf16.msra.mxu1 %v1165_v43  ;;  %1089 = vmatprep.subr.bf16.mxu0 %v1166_v44 }
  0x24   :  { %1111 = vmatprep.subr.bf16.mxu1 %v1167_v45 }
  0x96   :  { %v1396_v14 = vpop.xlane.xlu0 %92  ;;  %v1398_v15 = vpop.xlane.xlu1 %217 }
  0x97   :  { %v137_v20 = vmul.f32 %v103_v59, %v1396_v14  ;;  %v263_v21 = vmul.f32 %v229_v62, %v1398_v15  ;;  %v139_v22 = vmul.f32 %v111_v63, %v1396_v14  ;;  %v265_v23 = vmul.f32 %v237_v1, %v1398_v15 }
  0x98   :  { %v136_v24 = vmul.f32 %v99_v3, %v1396_v14  ;;  %v262_v25 = vmul.f32 %v225_v5, %v1398_v15  ;;  %v138_v26 = vmul.f32 %v107_v7, %v1396_v14  ;;  %v264_v27 = vmul.f32 %v233_v9, %v1398_v15  ;;  %v1169_v9 = vld [vmem:[%s1537_s3 + $0x1b8] sm:$0xff]  }
  0x99   :  { %v145_v28 = vadd.f32 %v137_v20, %v58_v58  ;;  %v147_v29 = vadd.f32 %v139_v22, %v66_v61  ;;  %v141_v30 = vmul.f32 %v119_v11, %v1396_v14  ;;  %v267_v31 = vmul.f32 %v245_v13, %v1398_v15  ;;  %v1171_v11 = vld [vmem:[%s1537_s3 + $0x1f0] sm:$0xff]   ;;  %v1176_v22 = vld [vmem:[%s1537_s3 + $0x128] sm:$0xff]  }
  0x9a   :  { %v1414_v32 = vpop.xlane.xlu0 %154  ;;  %v144_v33 = vadd.f32 %v136_v24, %v54_v2  ;;  %v146_v34 = vadd.f32 %v138_v26, %v62_v6  ;;  %v143_v35 = vmul.f32 %v127_v17, %v1396_v14  ;;  %v269_v36 = vmul.f32 %v253_v19, %v1398_v15  ;;  %v1173_v17 = vld [vmem:[%s1537_s3 + $0x1b0] sm:$0xff]   ;;  %v1175_v19 = vld [vmem:[%s1537_s3 + $0x1e8] sm:$0xff]   ;;  %v1178_v24 = vld [vmem:[%s1537_s3 + $0x160] sm:$0xff]  }
  0x9b   :  { %v200_v37 = vmul.f32 %v166_v60, %v1414_v32  ;;  %v202_v38 = vmul.f32 %v174_v0, %v1414_v32  ;;  %v199_v39 = vmul.f32 %v162_v4, %v1414_v32  ;;  %v201_v40 = vmul.f32 %v170_v8, %v1414_v32  ;;  %v1168_v8 = vld [vmem:[%s1537_s3 + $0x138] sm:$0xff]  }
  0x9c   :  { %v149_v41 = vadd.f32 %v141_v30, %v74_v10  ;;  %v204_v42 = vmul.f32 %v182_v12, %v1414_v32  ;;  %v151_v43 = vadd.f32 %v143_v35, %v82_v16  ;;  %v206_v44 = vmul.f32 %v190_v18, %v1414_v32  ;;  %v1170_v10 = vld [vmem:[%s1537_s3 + $0x170] sm:$0xff]   ;;  %v1174_v18 = vld [vmem:[%s1537_s3 + $0x168] sm:$0xff]  }
  0x9d   :  { %v208_v45 = vadd.f32 %v200_v37, %v145_v28  ;;  %v210_v46 = vadd.f32 %v202_v38, %v147_v29  ;;  %v207_v48 = vadd.f32 %v199_v39, %v144_v33  ;;  %v209_v52 = vadd.f32 %v201_v40, %v146_v34  ;;  %v1172_v16 = vld [vmem:[%s1537_s3 + $0x130] sm:$0xff]   ;;  %v1181_v28 = vld [vmem:[%s1537_s3 + $0x1a0] sm:$0xff]   ;;  %v1182_v29 = vld [vmem:[%s1537_s3 + $0x158] sm:$0xff]  }
  0x9e   :  { %v212_v54 = vadd.f32 %v204_v42, %v149_v41  ;;  %v214_v55 = vadd.f32 %v206_v44, %v151_v43  ;;  %v69_v20 = vsub.s32 4, %v1348_v47  ;;  %v1184_v37 = vld [vmem:[%s1537_s3 + $0x118] sm:$0xff]   ;;  %v1188_v44 = vld [vmem:[%s1537_s3 + $0x110] sm:$0xff]  }
  0x9f   :  { %v271_v56 = vadd.f32 %v263_v21, %v208_v45  ;;  %v273_v57 = vadd.f32 %v265_v23, %v210_v46  ;;  %v270_v58 = vadd.f32 %v262_v25, %v207_v48  ;;  %v272_v59 = vadd.f32 %v264_v27, %v209_v52  ;;  %v1177_v23 = vld [vmem:[%s1537_s3 + $0x1a8] sm:$0xff]   ;;  %v1180_v27 = vld [vmem:[%s1537_s3 + $0x120] sm:$0xff]   ;;  %v1185_v38 = vld [vmem:[%s1537_s3 + $0x198] sm:$0xff]  }
  0xa0   :  { %v275_v60 = vadd.f32 %v267_v31, %v212_v54  ;;  %v277_v61 = vadd.f32 %v269_v36, %v214_v55  ;;  %v77_v21 = vsub.s32 6, %v1348_v47  ;;  %v1179_v47 = vld [vmem:[%s1537_s3 + $0x1e0] sm:$0xff]   ;;  %v115_v25 = vrot.slane %v1359_v50, %v69_v20  ;;  %v1189_v45 = vld [vmem:[%s1537_s3 + $0x190] sm:$0xff]   ;;  %v1192_v55 = vld [vmem:[%s1537_s3 + $0x108] sm:$0xff]  }
  0xa1   :  { %v279_v62 = vmax.f32 %v271_v56, 0.0  ;;  %v281_v63 = vmax.f32 %v273_v57, 0.0  ;;  %v278_v0 = vmax.f32 %v270_v58, 0.0  ;;  %v280_v1 = vmax.f32 %v272_v59, 0.0  ;;  %v1193_v56 = vld [vmem:[%s1537_s3 + $0x188] sm:$0xff]   ;;  %v1194_v57 = vld [vmem:[%s1537_s3 + $0x140] sm:$0xff]  }
  0xa2   :  { %v283_v2 = vmax.f32 %v275_v60, 0.0  ;;  %v285_v3 = vmax.f32 %v277_v61, 0.0  ;;  %v123_v26 = vrot.slane %v1359_v50, %v77_v21  ;;  %v1183_v50 = vld [vmem:[%s1537_s3 + $0x1d8] sm:$0xff]   ;;  %v178_v30 = vrot.slane %v1364_v51, %v69_v20  ;;  %v1196_v60 = vld [vmem:[%s1537_s3 + $0x100] sm:$0xff]  }
  0xa3   :  { %v287_v4 = vpack.c.bf16 %v279_v62, %v279_v62  ;;  %v289_v5 = vpack.c.bf16 %v281_v63, %v281_v63  ;;  %v286_v6 = vpack.c.bf16 %v278_v0, %v278_v0  ;;  %v288_v7 = vpack.c.bf16 %v280_v1, %v280_v1  ;;  %v1197_v61 = vld [vmem:[%s1537_s3 + $0x180] sm:$0xff]  }
  0xa4   :  { %v291_v12 = vpack.c.bf16 %v283_v2, %v283_v2  ;;  %v293_v13 = vpack.c.bf16 %v285_v3, %v285_v3  ;;  %v186_v31 = vrot.slane %v1364_v51, %v77_v21  ;;  %v70_v33 = vrot.slane %v1354_v49, %v69_v20 }
  0xa5   :  { %845 = vmatprep.mubr.bf16.mxu0 %v287_v4  ;;  %885 = vmatprep.mubr.bf16.mxu1 %v289_v5  ;;  %v140_v34 = vmul.f32 %v115_v25, %v1396_v14  ;;  %v78_v35 = vrot.slane %v1354_v49, %v77_v21  ;;  %v142_v36 = vmul.f32 %v123_v26, %v1396_v14  ;;  %v1186_v49 = vld [vmem:[%s1537_s3 + $0x150] sm:$0xff]  }
  0xa6   :  { %846 = vmatmul.mubr.bf16.vlgmr.msra.gmra.mxu0 %v286_v6  ;;  %886 = vmatmul.mubr.bf16.vlgmr.msra.gmra.mxu1 %v288_v7  ;;  %v241_v51 = vrot.slane %v1370_v53, %v69_v20  ;;  %v1187_v14 = vld [vmem:[%s1537_s3 + $0x1d0] sm:$0xff]   ;;  %v203_v39 = vmul.f32 %v178_v30, %v1414_v32  ;;  %v205_v40 = vmul.f32 %v186_v31, %v1414_v32  ;;  %v1191_v32 = vld [vmem:[%s1537_s3 + $0x1c8] sm:$0xff]  }
  0xa7   :  { %1090 = vmatpush3.bf16.msra.mxu0 %v1168_v8  ;;  %1112 = vmatpush3.bf16.msra.mxu1 %v1169_v9  ;;  %v249_v41 = vrot.slane %v1370_v53, %v77_v21  ;;  %v148_v42 = vadd.f32 %v140_v34, %v70_v33  ;;  %v150_v43 = vadd.f32 %v142_v36, %v78_v35  ;;  %v1190_v53 = vld [vmem:[%s1537_s3 + $0x148] sm:$0xff]  }
  0xa8   :  { %925 = vmatprep.mubr.bf16.mxu0 %v291_v12  ;;  %965 = vmatprep.mubr.bf16.mxu1 %v293_v13  ;;  %v266_v46 = vmul.f32 %v241_v51, %v1398_v15 }
  0xa9   :  { %1091 = vmatprep.subr.bf16.mxu0 %v1170_v10  ;;  %1113 = vmatprep.subr.bf16.mxu1 %v1171_v11  ;;  %v211_v48 = vadd.f32 %v203_v39, %v148_v42  ;;  %v213_v52 = vadd.f32 %v205_v40, %v150_v43  ;;  %v268_v54 = vmul.f32 %v249_v41, %v1398_v15  ;;  %v1195_v15 = vld [vmem:[%s1537_s3 + $0x1c0] sm:$0xff]  }
  0xaa   :  { %v980_v11 = vld [vmem:[%s1540_s4] ss:$0 sm:$0xff] }
  0xab   :  { %1092 = vmatpush3.bf16.msra.mxu0 %v1172_v16  ;;  %1114 = vmatpush3.bf16.msra.mxu1 %v1173_v17  ;;  %v274_v58 = vadd.f32 %v266_v46, %v211_v48  ;;  %v276_v59 = vadd.f32 %v268_v54, %v213_v52 }
  0xac   :  { %1093 = vmatprep.subr.bf16.mxu0 %v1174_v18  ;;  %1115 = vmatprep.subr.bf16.mxu1 %v1175_v19 }
  0xad   :  { %v282_v62 = vmax.f32 %v274_v58, 0.0  ;;  %v284_v63 = vmax.f32 %v276_v59, 0.0 }
  0xaf   :  { %1094 = vmatpush3.bf16.msra.mxu0 %v1176_v22  ;;  %1116 = vmatpush3.bf16.msra.mxu1 %v1177_v23  ;;  %v290_v0 = vpack.c.bf16 %v282_v62, %v282_v62  ;;  %v292_v1 = vpack.c.bf16 %v284_v63, %v284_v63 }
  0xb0   :  { %1095 = vmatprep.subr.bf16.mxu0 %v1178_v24  ;;  %1117 = vmatprep.subr.bf16.mxu1 %v1179_v47 }
  0xb3   :  { %1096 = vmatpush3.bf16.msra.mxu0 %v1180_v27  ;;  %1118 = vmatpush3.bf16.msra.mxu1 %v1181_v28 }
  0xb4   :  { %1097 = vmatprep.subr.bf16.mxu0 %v1182_v29  ;;  %1119 = vmatprep.subr.bf16.mxu1 %v1183_v50 }
  0xb7   :  { %1098 = vmatpush3.bf16.msra.mxu0 %v1184_v37  ;;  %1120 = vmatpush3.bf16.msra.mxu1 %v1185_v38 }
  0xb8   :  { %1099 = vmatprep.subr.bf16.mxu0 %v1186_v49  ;;  %1121 = vmatprep.subr.bf16.mxu1 %v1187_v14 }
  0xbb   :  { %1100 = vmatpush3.bf16.msra.mxu0 %v1188_v44  ;;  %1122 = vmatpush3.bf16.msra.mxu1 %v1189_v45 }
  0xbc   :  { %1101 = vmatprep.subr.bf16.mxu0 %v1190_v53  ;;  %1123 = vmatprep.subr.bf16.mxu1 %v1191_v32 }
  0xbf   :  { %1102 = vmatpush3.bf16.msra.mxu0 %v1192_v55  ;;  %1124 = vmatpush3.bf16.msra.mxu1 %v1193_v56 }
  0xc0   :  { %1103 = vmatprep.subr.bf16.mxu0 %v1194_v57  ;;  %1125 = vmatprep.subr.bf16.mxu1 %v1195_v15 }
  0xc3   :  { %1104 = vmatpush3.bf16.msra.mxu0 %v1196_v60  ;;  %1126 = vmatpush3.bf16.msra.mxu1 %v1197_v61 }
  0xc6   :  { %926 = vmatmul.mubr.bf16.vlgmr.msra.gmra.mxu0 %v290_v0  ;;  %966 = vmatmul.mubr.bf16.vlgmr.msra.gmra.mxu1 %v292_v1 }
 0x166   :  { %v1061_v2 = vpop.f32.mrf.mxu0  ;;  %v1083_v3 = vpop.f32.mrf.mxu1 }
 0x168   :  { %v1062_v4 = vpop.f32.mrf.mxu0  ;;  %v1084_v5 = vpop.f32.mrf.mxu1 }
 0x169   :  { %v1063_v10 = vadd.f32 %v1062_v4, %v1061_v2  ;;  %v1085_v17 = vadd.f32 %v1084_v5, %v1083_v3 }
 0x16a   :  { %v1064_v6 = vpop.f32.mrf.mxu0  ;;  %v1086_v7 = vpop.f32.mrf.mxu1 }
 0x16b   :  { %v848_v12 = vadd.f32 %v1063_v10, %v980_v11 }
 0x16c   :  { %v1065_v8 = vpop.f32.mrf.mxu0  ;;  %v1087_v9 = vpop.f32.mrf.mxu1 }
 0x16d   :  { %v888_v20 = vadd.f32 %v1085_v17, %v848_v12 }
 0x186   :  { %v1105_v13 = vpop.f32.mrf.mxu0  ;;  %v1127_v16 = vpop.f32.mrf.mxu1 }
 0x188   :  { %v1106_v18 = vpop.f32.mrf.mxu0  ;;  %v1128_v19 = vpop.f32.mrf.mxu1 }
 0x189   :  { %v1107_v21 = vadd.f32 %v1106_v18, %v1105_v13  ;;  %v1129_v47 = vadd.f32 %v1128_v19, %v1127_v16 }
 0x18a   :  { %v1108_v22 = vpop.f32.mrf.mxu0  ;;  %v1130_v23 = vpop.f32.mrf.mxu1 }
 0x18b   :  { %v928_v24 = vadd.f32 %v1107_v21, %v888_v20 }
 0x18c   :  { %v1109_v25 = vpop.f32.mrf.mxu0  ;;  %v1131_v26 = vpop.f32.mrf.mxu1 }
 0x18d   :  { %v968_v27 = vadd.f32 %v1129_v47, %v928_v24 }
 0x18f   :  { %973 = vst [vmem:[%s1541_s5] sm:$0xff] %v968_v27 }

</bundles_post_ra>
